<compile_context>
chip_gen: v5e
topology: v5e:2x2
jax: 0.10.0
libtpu: 0.0.40
codegen_flags: <defaults>
</compile_context>

<pallas_src>
import functools
import math

import jax
import jax.numpy as jnp
from jax.experimental import pallas as pl
from jax.experimental.pallas import tpu as pltpu


def _round_up(x, m):
    return (x + m - 1) // m * m


# --------------------------------------------------------------------------
# Kernel
# --------------------------------------------------------------------------
def adapter_kernel(*refs, scale, eps, add_residual, separate_residual):
    if separate_residual:
        (x_ref, res_ref, g_ref, b_ref, dw_ref, db_ref, uw_ref, ub_ref,
         o_ref) = refs
    else:
        x_ref, g_ref, b_ref, dw_ref, db_ref, uw_ref, ub_ref, o_ref = refs
        res_ref = None

    d = x_ref.shape[-1]
    inv_d = 1.0 / float(d)

    # --- LayerNorm ('in'), f32 stats (v5e has no bf16 VPU) ---
    x = x_ref[...].astype(jnp.float32)
    mu = jnp.sum(x, axis=-1, keepdims=True) * inv_d
    xc = x - mu
    var = jnp.sum(xc * xc, axis=-1, keepdims=True) * inv_d
    xn = xc * jax.lax.rsqrt(var + eps)
    xn = xn * g_ref[...] + b_ref[...]

    # --- down_proj + ReLU (bf16 MXU operands, f32 accumulate) ---
    down = jnp.dot(xn.astype(dw_ref.dtype), dw_ref[...],
                   preferred_element_type=jnp.float32)
    down = jnp.maximum(down + db_ref[...], 0.0)

    # --- up_proj, then the module's scalar scale as a cheap f32 VPU mul ---
    up = jnp.dot(down.astype(uw_ref.dtype), uw_ref[...],
                 preferred_element_type=jnp.float32)
    up = (up + ub_ref[...]) * scale

    if add_residual:
        # Re-read the input block here (instead of keeping the f32 `x`
        # temporary alive across both matmuls) to shorten live ranges.
        r = res_ref[...] if separate_residual else x_ref[...]
        up = up + r.astype(jnp.float32)

    o_ref[...] = up.astype(o_ref.dtype)


# --------------------------------------------------------------------------
# One-time parameter preparation (cache the result across forward calls)
# --------------------------------------------------------------------------
def prepare_adapter_params(params, weight_dtype=jnp.bfloat16):
    """Casts projection weights to bf16 and reshapes biases/LN params to
    (1, ·).  Call once and reuse the returned dict for every forward."""
    D, H = params["down_w"].shape
    return {
        "ln_g": params["ln_g"].astype(jnp.float32).reshape(1, D),
        "ln_b": params["ln_b"].astype(jnp.float32).reshape(1, D),
        "down_w": params["down_w"].astype(weight_dtype),          # (D, H)
        "down_b": params["down_b"].astype(jnp.float32).reshape(1, H),
        "up_w": params["up_w"].astype(weight_dtype),              # (H, D)
        "up_b": params["up_b"].astype(jnp.float32).reshape(1, D),
    }


# --------------------------------------------------------------------------
# Tiling / VMEM heuristics (per TPU generation)
# --------------------------------------------------------------------------
def _tpu_vmem_capacity_bytes():
    try:
        cap = int(getattr(pltpu.get_tpu_info(), "vmem_capacity_bytes", 0))
        if cap > 0:
            return cap
    except Exception:
        pass
    return 64 << 20  # conservative default (v7x per-TensorCore VMEM)


def _choose_tile_and_vmem(M, D, H, in_itemsize, out_itemsize,
                          separate_residual, const_bytes):
    cap = _tpu_vmem_capacity_bytes()
    budget = int(0.8 * cap)                 # headroom for compiler internals
    sublane = {4: 8, 2: 16, 1: 32}.get(in_itemsize, 8)

    if cap >= (96 << 20):                   # v5e / v6e class (128 MiB VMEM)
        tm = 1024 if D <= 2048 else 512
    else:                                   # v7x class (64 MiB VMEM per TC)
        tm = 512 if in_itemsize <= 2 else 256
        if D >= 8192:
            tm //= 2

    def est(t):
        act = t * D
        stream = 2 * act * in_itemsize + 2 * act * out_itemsize  # dbl-buffered
        if separate_residual:
            stream += 2 * act * in_itemsize
        # in-kernel temporaries: ~4 f32 (x/xc/xn/up) + 1 bf16 (xn cast) of
        # (t, D), plus f32 + bf16 of (t, H) for `down`.
        temps = act * (4 * 4 + 2) + t * H * (4 + 2)
        return stream + temps + 2 * const_bytes

    while tm > sublane and est(tm) > budget:
        tm //= 2
    # keep >= 2 grid steps when possible so both v7x TensorCores get work
    while tm > sublane and M > sublane and pl.cdiv(M, tm) < 2:
        tm //= 2
    tm = max(sublane, _round_up(min(tm, _round_up(M, sublane)), sublane))
    vmem_limit = max(min(budget, cap - (4 << 20)), 16 << 20)
    return tm, vmem_limit


# --------------------------------------------------------------------------
# Forward
# --------------------------------------------------------------------------
def adapter_forward(x, prepared, *, scale=1.0, eps=1e-5, add_residual=True,
                    residual=None):
    """Fused adapter forward.  x: (B, N, D); `prepared` comes from
    prepare_adapter_params (cache it across calls)."""
    # TODO(synk): only adapter_layernorm_option='in' (the module default) is
    # fused here; the 'out'/None variants would need a different kernel wiring.
    B, N, D = x.shape
    H = prepared["down_w"].shape[1]
    M = B * N
    out_dtype = x.dtype
    in_itemsize = jnp.dtype(x.dtype).itemsize
    out_itemsize = jnp.dtype(out_dtype).itemsize

    separate_residual = bool(add_residual) and (residual is not None)

    const_arrays = (prepared["ln_g"], prepared["ln_b"], prepared["down_w"],
                    prepared["down_b"], prepared["up_w"], prepared["up_b"])
    const_bytes = sum(int(a.size) * a.dtype.itemsize for a in const_arrays)

    tm, vmem_limit = _choose_tile_and_vmem(
        M, D, H, in_itemsize, out_itemsize, separate_residual, const_bytes)
    grid = (pl.cdiv(M, tm),)

    # ---- inputs: just flatten tokens; no padding, no post-slice ----
    x2 = x.reshape(M, D)
    inputs = [x2]
    if separate_residual:
        inputs.append(residual.reshape(M, D))
    inputs += list(const_arrays)

    kernel = functools.partial(
        adapter_kernel,
        scale=float(scale), eps=float(eps),
        add_residual=bool(add_residual),
        separate_residual=separate_residual)

    row_spec = pl.BlockSpec((tm, D), lambda i: (i, 0))
    in_specs = [row_spec] + ([row_spec] if separate_residual else [])
    in_specs += [pl.BlockSpec((1, D), lambda i: (0, 0)),   # ln gamma
                 pl.BlockSpec((1, D), lambda i: (0, 0)),   # ln beta
                 pl.BlockSpec((D, H), lambda i: (0, 0)),   # down weight
                 pl.BlockSpec((1, H), lambda i: (0, 0)),   # down bias
                 pl.BlockSpec((H, D), lambda i: (0, 0)),   # up weight
                 pl.BlockSpec((1, D), lambda i: (0, 0))]   # up bias

    io_bytes = (M * D * in_itemsize * (2 if separate_residual else 1)
                + M * D * out_itemsize + const_bytes)
    cost = pl.CostEstimate(flops=4 * M * D * H, transcendentals=M,
                           bytes_accessed=io_bytes)

    out2 = pl.pallas_call(
        kernel,
        out_shape=jax.ShapeDtypeStruct((M, D), out_dtype),
        grid_spec=pltpu.PrefetchScalarGridSpec(
            num_scalar_prefetch=0,
            grid=grid,
            in_specs=in_specs,
            out_specs=pl.BlockSpec((tm, D), lambda i: (i, 0))),
        compiler_params=pltpu.CompilerParams(
            dimension_semantics=("parallel",),
            vmem_limit_bytes=int(vmem_limit)),
        cost_estimate=cost,
    )(*inputs)

    return out2.reshape(B, N, D)


# --------------------------------------------------------------------------
# Pure-JAX reference (same numerics: bf16 MXU operands, f32 accumulation)
# --------------------------------------------------------------------------
def adapter_reference(x, params, *, scale=1.0, eps=1e-5, add_residual=True,
                      residual=None):
    residual = x if residual is None else residual
    xf = x.astype(jnp.float32)
    mu = jnp.mean(xf, axis=-1, keepdims=True)
    var = jnp.mean((xf - mu) ** 2, axis=-1, keepdims=True)
    xn = (xf - mu) * jax.lax.rsqrt(var + eps)
    xn = xn * params["ln_g"] + params["ln_b"]
    dw = params["down_w"].astype(jnp.bfloat16)
    uw = params["up_w"].astype(jnp.bfloat16)
    down = jnp.dot(xn.astype(jnp.bfloat16), dw,
                   preferred_element_type=jnp.float32) + params["down_b"]
    down = jnp.maximum(down, 0.0)
    up = jnp.dot(down.astype(jnp.bfloat16), uw,
                 preferred_element_type=jnp.float32) + params["up_b"]
    up = up * scale
    out = (up + residual.astype(jnp.float32)) if add_residual else up
    return out.astype(x.dtype)


def init_params(key, d_model, bottleneck):
    """Shapes follow the PyTorch module (down: Linear(D,H), up: Linear(H,D),
    LayerNorm(D)).  NOTE: the reference 'lora' init zeros up_proj (output ==
    residual); here up_proj gets small nonzero values so the kernel's compute
    path is actually exercised."""
    k1, k2, k3, k4 = jax.random.split(key, 4)
    bound = 1.0 / math.sqrt(d_model)          # kaiming_uniform_(a=sqrt(5))
    down_w_t = jax.random.uniform(k1, (bottleneck, d_model),
                                  minval=-bound, maxval=bound,
                                  dtype=jnp.float32)
    up_w_t = 0.02 * jax.random.normal(k2, (d_model, bottleneck),
                                      dtype=jnp.float32)
    return {
        "ln_g": jnp.ones((d_model,), jnp.float32),
        "ln_b": jnp.zeros((d_model,), jnp.float32),
        "down_w": down_w_t.T,                              # (D, H)
        "down_b": jax.random.uniform(k3, (bottleneck,), minval=-0.1, maxval=0.1),
        "up_w": up_w_t.T,                                  # (H, D)
        "up_b": jax.random.uniform(k4, (d_model,), minval=-0.1, maxval=0.1),
    }


if __name__ == "__main__":
    key = jax.random.PRNGKey(0)
    kx, kr, kp, kx2 = jax.random.split(key, 4)

    B, N, D, H = 2, 8, 32, 16           # batch, seq, d_model, bottleneck
    x = jax.random.normal(kx, (B, N, D), dtype=jnp.float32)
    ext_res = jax.random.normal(kr, (B, N, D), dtype=jnp.float32)
    params = init_params(kp, D, H)
    prepared = prepare_adapter_params(params)   # cached once, reused below
    scale = 0.5

    # 1) default path: residual = x (reused in-kernel), add_residual=True
    out = jax.block_until_ready(adapter_forward(x, prepared, scale=scale))
    ref = adapter_reference(x, params, scale=scale)
    assert out.shape == (B, N, D)
    assert jnp.allclose(out, ref, atol=2e-3, rtol=2e-3), "mismatch (default)"

    # 2) caller-supplied residual (separate DMA stream)
    out_r = jax.block_until_ready(
        adapter_forward(x, prepared, scale=scale, residual=ext_res))
    ref_r = adapter_reference(x, params, scale=scale, residual=ext_res)
    assert jnp.allclose(out_r, ref_r, atol=2e-3, rtol=2e-3), "mismatch (residual)"

    # 3) add_residual=False
    out_n = jax.block_until_ready(
        adapter_forward(x, prepared, scale=scale, add_residual=False))
    ref_n = adapter_reference(x, params, scale=scale, add_residual=False)
    assert jnp.allclose(out_n, ref_n, atol=2e-3, rtol=2e-3), "mismatch (no residual)"

    # 4) ragged token count (M not a multiple of the row tile): exercises the
    #    clipped last block (no host-side pad / slice round-trips).
    Br, Nr = 3, 5
    xr = jax.random.normal(kx2, (Br, Nr, D), dtype=jnp.float32)
    out_rag = jax.block_until_ready(adapter_forward(xr, prepared, scale=scale))
    ref_rag = adapter_reference(xr, params, scale=scale)
    assert jnp.allclose(out_rag, ref_rag, atol=2e-3, rtol=2e-3), "mismatch (ragged)"

    # 5) bf16 activation I/O at the kernel boundary (halves the HBM streams)
    xb = x.astype(jnp.bfloat16)
    out_b = jax.block_until_ready(adapter_forward(xb, prepared, scale=scale))
    ref_b = adapter_reference(xb, params, scale=scale)
    assert jnp.allclose(out_b.astype(jnp.float32), ref_b.astype(jnp.float32),
                        atol=5e-2, rtol=5e-2), "mismatch (bf16 I/O)"

    print("KERNEL_OK")
</pallas_src>

<mosaic_0001>
module attributes {stable_mosaic.version = 11 : i64} {
  func.func @adapter_kernel(%arg0: i32, %arg1: memref<8x32xf32, #tpu.memory_space<vmem>>, %arg2: memref<1x32xf32, #tpu.memory_space<vmem>>, %arg3: memref<1x32xf32, #tpu.memory_space<vmem>>, %arg4: memref<32x16xbf16, #tpu.memory_space<vmem>>, %arg5: memref<1x16xf32, #tpu.memory_space<vmem>>, %arg6: memref<16x32xbf16, #tpu.memory_space<vmem>>, %arg7: memref<1x32xf32, #tpu.memory_space<vmem>>, %arg8: memref<8x32xf32, #tpu.memory_space<vmem>>) attributes {dimension_semantics = [#tpu.dimension_semantics<parallel>], iteration_bounds = array<i64: 2>, scalar_prefetch = 0 : i64, scratch_operands = 0 : i64, tpu.core_type = #tpu.core_type<tc>, window_params = [{transform_indices = @transform_0, window_bounds = array<i64: 8, 32>}, {pipeline_mode = #tpu.pipeline_mode<synchronous>, transform_indices = @transform_1, window_bounds = array<i64: 1, 32>}, {pipeline_mode = #tpu.pipeline_mode<synchronous>, transform_indices = @transform_2, window_bounds = array<i64: 1, 32>}, {pipeline_mode = #tpu.pipeline_mode<synchronous>, transform_indices = @transform_3, window_bounds = array<i64: 32, 16>}, {pipeline_mode = #tpu.pipeline_mode<synchronous>, transform_indices = @transform_4, window_bounds = array<i64: 1, 16>}, {pipeline_mode = #tpu.pipeline_mode<synchronous>, transform_indices = @transform_5, window_bounds = array<i64: 16, 32>}, {pipeline_mode = #tpu.pipeline_mode<synchronous>, transform_indices = @transform_6, window_bounds = array<i64: 1, 32>}, {transform_indices = @transform_7, window_bounds = array<i64: 8, 32>}]} {
    %c0 = arith.constant 0 : index
    %c0_0 = arith.constant 0 : index
    %0 = vector.load %arg1[%c0, %c0_0] : memref<8x32xf32, #tpu.memory_space<vmem>>, vector<8x32xf32>
    %cst = arith.constant dense<0.000000e+00> : vector<8xf32>
    %1 = vector.multi_reduction <add>, %0, %cst [1] : vector<8x32xf32> to vector<8xf32>
    %2 = vector.shape_cast %1 : vector<8xf32> to vector<8x1xf32>
    %cst_1 = arith.constant 3.125000e-02 : f32
    %3 = vector.broadcast %cst_1 : f32 to vector<8x1xf32>
    %4 = arith.mulf %2, %3 : vector<8x1xf32>
    %5 = vector.broadcast %4 : vector<8x1xf32> to vector<8x32xf32>
    %6 = arith.subf %0, %5 : vector<8x32xf32>
    %7 = arith.mulf %6, %6 : vector<8x32xf32>
    %cst_2 = arith.constant dense<0.000000e+00> : vector<8xf32>
    %8 = vector.multi_reduction <add>, %7, %cst_2 [1] : vector<8x32xf32> to vector<8xf32>
    %9 = vector.shape_cast %8 : vector<8xf32> to vector<8x1xf32>
    %cst_3 = arith.constant 3.125000e-02 : f32
    %10 = vector.broadcast %cst_3 : f32 to vector<8x1xf32>
    %11 = arith.mulf %9, %10 : vector<8x1xf32>
    %cst_4 = arith.constant 9.99999974E-6 : f32
    %12 = vector.broadcast %cst_4 : f32 to vector<8x1xf32>
    %13 = arith.addf %11, %12 : vector<8x1xf32>
    %14 = math.rsqrt %13 : vector<8x1xf32>
    %15 = vector.broadcast %14 : vector<8x1xf32> to vector<8x32xf32>
    %16 = arith.mulf %6, %15 : vector<8x32xf32>
    %c0_5 = arith.constant 0 : index
    %c0_6 = arith.constant 0 : index
    %17 = vector.load %arg2[%c0_5, %c0_6] : memref<1x32xf32, #tpu.memory_space<vmem>>, vector<1x32xf32>
    %18 = vector.broadcast %17 : vector<1x32xf32> to vector<8x32xf32>
    %19 = arith.mulf %16, %18 : vector<8x32xf32>
    %c0_7 = arith.constant 0 : index
    %c0_8 = arith.constant 0 : index
    %20 = vector.load %arg3[%c0_7, %c0_8] : memref<1x32xf32, #tpu.memory_space<vmem>>, vector<1x32xf32>
    %21 = vector.broadcast %20 : vector<1x32xf32> to vector<8x32xf32>
    %22 = arith.addf %19, %21 : vector<8x32xf32>
    %23 = arith.truncf %22 : vector<8x32xf32> to vector<8x32xbf16>
    %c0_9 = arith.constant 0 : index
    %c0_10 = arith.constant 0 : index
    %24 = vector.load %arg4[%c0_9, %c0_10] : memref<32x16xbf16, #tpu.memory_space<vmem>>, vector<32x16xbf16>
    %cst_11 = arith.constant dense<0.000000e+00> : vector<8x16xf32>
    %25 = tpu.matmul %23, %24, %cst_11 {dimension_numbers = #tpu.dot_dimension_numbers<[1], [0], [0], [1], [0, 0, 1, 1], [], []>} : vector<8x32xbf16>, vector<32x16xbf16>, vector<8x16xf32> -> vector<8x16xf32>
    %c0_12 = arith.constant 0 : index
    %c0_13 = arith.constant 0 : index
    %26 = vector.load %arg5[%c0_12, %c0_13] : memref<1x16xf32, #tpu.memory_space<vmem>>, vector<1x16xf32>
    %27 = vector.broadcast %26 : vector<1x16xf32> to vector<8x16xf32>
    %28 = arith.addf %25, %27 : vector<8x16xf32>
    %cst_14 = arith.constant 0.000000e+00 : f32
    %29 = vector.broadcast %cst_14 : f32 to vector<8x16xf32>
    %30 = arith.maximumf %28, %29 : vector<8x16xf32>
    %31 = arith.truncf %30 : vector<8x16xf32> to vector<8x16xbf16>
    %c0_15 = arith.constant 0 : index
    %c0_16 = arith.constant 0 : index
    %32 = vector.load %arg6[%c0_15, %c0_16] : memref<16x32xbf16, #tpu.memory_space<vmem>>, vector<16x32xbf16>
    %cst_17 = arith.constant dense<0.000000e+00> : vector<8x32xf32>
    %33 = tpu.matmul %31, %32, %cst_17 {dimension_numbers = #tpu.dot_dimension_numbers<[1], [0], [0], [1], [0, 0, 1, 1], [], []>} : vector<8x16xbf16>, vector<16x32xbf16>, vector<8x32xf32> -> vector<8x32xf32>
    %c0_18 = arith.constant 0 : index
    %c0_19 = arith.constant 0 : index
    %34 = vector.load %arg7[%c0_18, %c0_19] : memref<1x32xf32, #tpu.memory_space<vmem>>, vector<1x32xf32>
    %35 = vector.broadcast %34 : vector<1x32xf32> to vector<8x32xf32>
    %36 = arith.addf %33, %35 : vector<8x32xf32>
    %cst_20 = arith.constant 5.000000e-01 : f32
    %37 = vector.broadcast %cst_20 : f32 to vector<8x32xf32>
    %38 = arith.mulf %36, %37 : vector<8x32xf32>
    %c0_21 = arith.constant 0 : index
    %c0_22 = arith.constant 0 : index
    %39 = vector.load %arg1[%c0_21, %c0_22] : memref<8x32xf32, #tpu.memory_space<vmem>>, vector<8x32xf32>
    %40 = arith.addf %38, %39 : vector<8x32xf32>
    %c0_23 = arith.constant 0 : index
    %c0_24 = arith.constant 0 : index
    %41 = vector.load %arg8[%c0_23, %c0_24] : memref<8x32xf32, #tpu.memory_space<vmem>>, vector<8x32xf32>
    tpu.vector_store %arg8[%c0_23, %c0_24], %40 {strides = array<i32>} : memref<8x32xf32, #tpu.memory_space<vmem>>, vector<8x32xf32>,
    return
  }
  func.func @transform_0(%arg0: i32) -> (i32, i32) {
    %c0_i32 = arith.constant 0 : i32
    %c0_i32_0 = arith.constant 0 : i32
    return %arg0, %c0_i32 : i32, i32
  }
  func.func @transform_1(%arg0: i32) -> (i32, i32) {
    %c0_i32 = arith.constant 0 : i32
    %c0_i32_0 = arith.constant 0 : i32
    %c0_i32_1 = arith.constant 0 : i32
    return %c0_i32, %c0_i32_0 : i32, i32
  }
  func.func @transform_2(%arg0: i32) -> (i32, i32) {
    %c0_i32 = arith.constant 0 : i32
    %c0_i32_0 = arith.constant 0 : i32
    %c0_i32_1 = arith.constant 0 : i32
    return %c0_i32, %c0_i32_0 : i32, i32
  }
  func.func @transform_3(%arg0: i32) -> (i32, i32) {
    %c0_i32 = arith.constant 0 : i32
    %c0_i32_0 = arith.constant 0 : i32
    %c0_i32_1 = arith.constant 0 : i32
    return %c0_i32, %c0_i32_0 : i32, i32
  }
  func.func @transform_4(%arg0: i32) -> (i32, i32) {
    %c0_i32 = arith.constant 0 : i32
    %c0_i32_0 = arith.constant 0 : i32
    %c0_i32_1 = arith.constant 0 : i32
    return %c0_i32, %c0_i32_0 : i32, i32
  }
  func.func @transform_5(%arg0: i32) -> (i32, i32) {
    %c0_i32 = arith.constant 0 : i32
    %c0_i32_0 = arith.constant 0 : i32
    %c0_i32_1 = arith.constant 0 : i32
    return %c0_i32, %c0_i32_0 : i32, i32
  }
  func.func @transform_6(%arg0: i32) -> (i32, i32) {
    %c0_i32 = arith.constant 0 : i32
    %c0_i32_0 = arith.constant 0 : i32
    %c0_i32_1 = arith.constant 0 : i32
    return %c0_i32, %c0_i32_0 : i32, i32
  }
  func.func @transform_7(%arg0: i32) -> (i32, i32) {
    %c0_i32 = arith.constant 0 : i32
    %c0_i32_0 = arith.constant 0 : i32
    return %arg0, %c0_i32 : i32, i32
  }
}

</mosaic_0001>

<bundles_post_ra>
// kernel: tpu_custom_call.1
= control target key start
LH: loop header
LB: loop body
LE: loop exit
PB: predicated region body
PF: predicated region fallthrough
CT: control target
= control target key end

     0   :  { %12 = vsyncpa [#allocation3], 0  ;;  %s817_s0 = inlined_call_operand.vmem [shape: f32[16,32], index: 0, kind: input, shape index: {}]   ;;  %s818_s1 = inlined_call_operand.hbm [shape: f32[1,32], index: 1, kind: input, shape index: {}]   ;;  %s819_s2 = inlined_call_operand.vmem [shape: f32[1,32], index: 2, kind: input, shape index: {}]   ;;  %s820_s3 = inlined_call_operand.vmem [shape: bf16[32,16], index: 3, kind: input, shape index: {}]   ;;  %s821_s4 = inlined_call_operand.vmem [shape: f32[1,16], index: 4, kind: input, shape index: {}]   ;;  %s822_s5 = inlined_call_operand.vmem [shape: bf16[16,32], index: 5, kind: input, shape index: {}]   ;;  %s823_s6 = inlined_call_operand.vmem [shape: f32[1,32], index: 6, kind: input, shape index: {}]   ;;  %s824_s7 = inlined_call_operand.hbm [shape: f32[16,32], index: 7, kind: output, shape index: {}]  }
   0x1   :  { %13 = vsyncpa [#allocation4], 0 }
   0x2   :  { %15 = vsyncpa [#allocation4 + $0x1], 0  ;;  %s706_s24 = smov 0   ;;  %s708_s25 = smov 0  }
   0x3   :  { %s710_s26 = smov 0   ;;  %s712_s27 = smov 0  }
   0x4 LB: > { %s727_s28 = sadd.s32 4294967295, %s663_s27   ;;  %s482_s29 = sadd.s32 4294967294, %s663_s27   ;;  %s663_s27 = sphi %s712_s27, %s830_s27   ;;  %s659_s26 = sphi %s710_s26, %s829_s26   ;;  %s655_s25 = sphi %s708_s25, %s828_s25   ;;  %s651_s24 = sphi %s706_s24, %s827_s24  }
   0x5   : > { %s731_s30 = sadd.s32 1, %s663_s27   ;;  %s180_s8 = sadd.s32 1, %s659_s26 }
   0x6   : > { %s177_s9 = ssub.s32 %s663_s27, %s731_s30  ;;  %p190_p0 = scmp.ne.s32.totalorder %s659_s26, %s655_s25 }
   0x7   : > { %p178_p1 = scmp.eq.s32.totalorder %s177_s9, 0  ;;  %p191_p2 = scmp.eq.s32.totalorder %s727_s28, 1 }
   0x8   : > { %p196_p3 = scmp.ne.s32.totalorder %s655_s25, %s651_s24  ;;  %p197_p4 = scmp.eq.s32.totalorder %s482_s29, 1 }
   0x9   : > { %s742_s10 = scalar_select %p178_p1, %s659_s26, %s180_s8  }
   0xa   : > { %p744_p5 = por %p191_p2, %p190_p0  ;;  %p748_p6 = por %p197_p4, %p196_p3 }
   0xb   : > { %p483_p7 = scmp.ge.s32.totalorder %s663_s27, 1  ;;  %p204_p8 = scmp.lt.s32.totalorder %s663_s27, 3 }
   0xc   : > { %p525_p9 = scmp.eq.s32.totalorder %s727_s28, 0  ;;  %s216_s15 = sshll.u32 %s818_s1, 4  ;;  %s217_s15 = int_to_ptr.hbm [resolvable:$true] %s216_s15 }
   0xd   : > { %p205_p10 = pnand %p483_p7, %p204_p8  ;;  %s665_s16 = smov [#allocation2]  }
   0xe   : > { %s218_s17 = sshll.u32 %s665_s16, 4  ;;  %s219_s17 = int_to_ptr.vmem [resolvable:$true] %s218_s17 }
   0xf   : > { %p517_p11 = pneg %p205_p10  ;;  %253 = sbr.rel (%p205_p10) target bundleno = 566 (0x236), region = 48 }
  0x11   : > { %p518_p12 = pnand %p525_p9, %p517_p11 }
  0x13   : > { %520 = dma.hbm_to_vmem [thread:$0]  (!%p518_p12), %s217_s15, 16, %s219_s17, [#allocation3]  }
  0x14   : > { %642 = dma.done.wait (%p525_p9), [#allocation3], 16  }
  0x15   : > { %644 = vsyncadd (%p525_p9), [#allocation3], 4294967280  ;;  %p285_p13 = scmp.lt.s32.totalorder %s727_s28, 1  ;;  %vm291_vm0 = vcmask 261120   ;;  %v509_v7 = vld [vmem:[%s820_s3 + $0x8] sm:$0xff]  ;;  %v508_v8 = vld [vmem:[%s820_s3] sm:$0xff] }
  0x16   : > { %354 = vmatpush.bf16.msra.mxu0 %v509_v7  ;;  %v561_v18 = vld [vmem:[#allocation2] ss:$0 sm:$0xff]  ;;  %vm375_vm4 = vcmask 130048   ;;  %s505_s21 = sshll.u32 %s727_s28, 3 }
  0x17   : > { %s286_s18 = scalar_select %p285_p13, %s727_s28, 1  ;;  %v562_v21 = vld [vmem:[%s819_s2] ss:$0 sm:$0xff] }
  0x18   : > { %v510_v25 = vld [vmem:[%s822_s5] sm:$0xff]  ;;  %s406_s9 = scalar_lea.hbm %s824_s7, %s505_s21 }
  0x19   : > { %s489_s19 = sshll.u32 %s286_s18, 3  ;;  %386 = vmatpush.bf16.msra.mxu1 %v510_v25  ;;  %v563_v26 = vld [vmem:[%s821_s4] ss:$0 sm:$0xff]  ;;  %s410_s15 = sshll.u32 %s406_s9, 4  ;;  %s411_s15 = int_to_ptr.hbm [resolvable:$true] %s410_s15 }
  0x1a   : > { %s288_s22 = scalar_lea.vmem %s817_s0, %s489_s19  ;;  %355 = vmatpush.bf16.msra.mxu0 %v508_v8  ;;  %s282_s19 = sand.u32 1, %s655_s25   ;;  %v564_v32 = vld [vmem:[%s823_s6] ss:$0 sm:$0xff] }
  0x1b   : > { %v290_v0 = vld [vmem:[%s288_s22] sm:$0xff]  ;;  %s488_s20 = sshll.u32 %s282_s19, 3  ;;  %s396_s28 = scalar_lea.sflag [#allocation4], %s282_s19 }
  0x1c   : > { %v292_v1 = vsel %vm291_vm0, %v290_v0, 0.0  ;;  %s284_s13 = scalar_lea.vmem [#allocation5], %s488_s20  ;;  %s611_s16 = sshra.s32 %s411_s15, 4  ;;  %s612_s16 = int_to_ptr.hbm [resolvable:$true] %s611_s16 }
  0x1d   : > { %293 = vadd.xlane.f32.xlu0 %v292_v1  ;;  %s408_s14 = sshll.u32 %s284_s13, 4  ;;  %s613_s17 = scalar_lea.hbm %s612_s16, 8  ;;  %s409_s14 = int_to_ptr.vmem [resolvable:$true] %s408_s14 }
  0x1e   : > { %p614_p0 = scmp.ne.s32.totalorder %s612_s16, %s613_s17  ;;  %s617_s20 = scalar_lea.hbm %s824_s7, 16 }
  0x1f   : > { %p618_p3 = scmp.lt.s32.totalorder %s612_s16, %s824_s7  ;;  %p619_p4 = scmp.lt.s32.totalorder %s617_s20, %s613_s17 }
  0x20   : > { %p615_p1 = pnand %p614_p0, %p744_p5 }
  0x21   : > { %p620_p7 = por %p619_p4, %p618_p3 }
  0x22   : > { %p616_p2 = pneg %p615_p1 }
  0x24   : > { %p621_p8 = pnand %p620_p7, %p616_p2 }
  0x90   : > { %v294_v2 = vpop.xlane.xlu0 %293 }
  0x91   : > { %v295_v3 = vmul.f32 0.03125, %v294_v2 }
  0x93   : > { %v296_v4 = vsub.f32 %v290_v0, %v295_v3 }
  0x95   : > { %v297_v5 = vmul.f32 %v296_v4, %v296_v4 }
  0x97   : > { %v298_v6 = vsel %vm291_vm0, %v297_v5, 0.0 }
  0x98   : > { %299 = vadd.xlane.f32.xlu0 %v298_v6 }
 0x10b   : > { %v300_v9 = vpop.xlane.xlu0 %299 }
 0x10c   : > { %v301_v10 = vmul.f32 0.03125, %v300_v9 }
 0x10e   : > { %v302_v11 = vadd.f32 1e-05, %v301_v10 }
 0x110   : > { %565 = vrsqrt.f32 %v302_v11  ;;  %vm309_vm2 = vweird.f32 %v302_v11 }
 0x116   : > { %v566_v12 = vpop.eup %565 }
 0x117   : > { %v304_v13 = vmul.f32 %v566_v12, %v302_v11  ;;  %vm310_vm1 = vweird.f32 %v566_v12 }
 0x118   : > { %vm311_vm3 = vmor %vm309_vm2, %vm310_vm1 }
 0x119   : > { %v305_v14 = vmul.f32 %v566_v12, %v304_v13 }
 0x11b   : > { %v306_v15 = vmul.f32 0.5, %v305_v14 }
 0x11d   : > { %v307_v16 = vsub.f32 1.5, %v306_v15 }
 0x11f   : > { %v308_v17 = vmul.f32 %v566_v12, %v307_v16 }
 0x121   : > { %v312_v19 = vsel %vm311_vm3, %v566_v12, %v308_v17 }
 0x122   : > { %v313_v20 = vmul.f32 %v312_v19, %v296_v4 }
 0x124   : > { %v318_v22 = vmul.f32 %v561_v18, %v313_v20 }
 0x126   : > { %v323_v23 = vadd.f32 %v562_v21, %v318_v22 }
 0x128   : > { %v324_v24 = vpack.c.bf16 %v323_v23, %v323_v23 }
 0x12a   : > { %498 = vmatmul.msk.bf16.vlgmr.msra.gmra.mxu0 %vm291_vm0, %v324_v24 }
 0x1a7   : > { %v357_v27 = vpop.f32.mrf.mxu0 }
 0x1a8   : > { %v358_v28 = vadd.f32 %v563_v26, %v357_v27 }
 0x1aa   : > { %v361_v29 = vmax.f32 %v358_v28, 0.0 }
 0x1ac   : > { %v362_v30 = vpack.c.bf16 %v361_v29, %v361_v29 }
 0x1ae   : > { %503 = vmatmul.msk.bf16.vlgmr.msra.gmra.mxu1 %vm375_vm4, %v362_v30 }
 0x1af   : > { %v359_v31 = vpop.f32.mrf.mxu0 }
 0x22b   : > { %v388_v33 = vpop.f32.mrf.mxu1 }
 0x22c   : > { %v389_v34 = vadd.f32 %v564_v32, %v388_v33 }
 0x22e   : > { %v392_v35 = vmul.f32 0.5, %v389_v34 }
 0x230   : > { %v393_v36 = vadd.f32 %v392_v35, %v290_v0 }
 0x232   : > { %394 = vst.msk [vmem:[%s284_s13] sm:$0xff] %vm291_vm0, %v393_v36 }
 0x233   : > { %v390_v37 = vpop.f32.mrf.mxu1 }
 0x234   : > { %624 = shalt.err (!%p621_p8)
}
 0x235   : > { %515 = dma.vmem_to_hbm [thread:$0]  (%p744_p5), %s409_s14, 128, %s411_s15, %s396_s28  }
 0x236 PF: > { %p527_p9 = scmp.ge.s32.totalorder %s663_s27, 2  ;;  %s422_s19 = sand.u32 1, %s651_s24  }
 0x237   : > { %s423_s29 = scalar_lea.sflag [#allocation4], %s422_s19 }
 0x238   : > { %p522_p10 = pnand %p527_p9, %p748_p6 }
 0x23a   : > { %p523_p11 = pneg %p522_p10 }
 0x23c   : > { %646 = dma.done.wait (%p523_p11), %s423_s29, 128  }
 0x23d   : > { %648 = vsyncadd (%p523_p11), %s423_s29, 4294967168  ;;  %p18_p12 = scmp.ge.s32.totalorder %s731_s30, 4   ;;  %s827_s24 = smov %s655_s25 }
 0x23e   : > { %s828_s25 = smov %s659_s26  ;;  %s829_s26 = smov %s742_s10 }
 0x23f   : > { %s830_s27 = smov %s731_s30  ;;  %20 = sbr.rel (!%p18_p12) target bundleno = 4 (0x4), region = 88 }
 0x244   :  { %429 = vsyncpa [#allocation3], 1 }
 0x245   :  { %431 = vsyncpa [#allocation3 + $0x1], 1 }
 0x246   :  { %432 = vsyncpa [#allocation4], 1 }
 0x247   :  { %434 = vsyncpa [#allocation4 + $0x1], 1 }

</bundles_post_ra>
